<compile_context>
chip_gen: v5e
topology: v5e:2x2
jax: 0.10.0
libtpu: 0.0.40
codegen_flags: <defaults>
</compile_context>

<pallas_src>
import functools

import jax
import jax.numpy as jnp
from jax.experimental import pallas as pl
from jax.experimental.pallas import tpu as pltpu

_LANE = 128


def _round_up(x, m):
    return ((x + m - 1) // m) * m


def _pow_static(x, gamma):
    """x ** gamma for a STATIC python gamma.

    Integer gamma -> repeated multiplication (VALU), keeping the single EUP
    free for the softmax exp. Falls back to jnp.power for non-integer gamma.
    """
    g = float(gamma)
    if g == 0.0:
        return jnp.ones_like(x)
    if g.is_integer() and 0 < g <= 8:
        r = x
        for _ in range(int(g) - 1):
            r = r * x
        return r
    return jnp.power(x, g)


def _vmem_capacity_bytes():
    """Per-core VMEM capacity; conservative (v7x-sized) fallback."""
    try:
        return int(pltpu.get_tpu_info().vmem_capacity_bytes)
    except Exception:
        return 64 * 1024 * 1024


def _focal_loss_kernel(x_ref, t_ref, a_ref, out_ref, *, gamma, n_rows, tile_rows):
    i = pl.program_id(0)

    x = x_ref[...].astype(jnp.float32)       # (TN, C) logits tile
    t = t_ref[...]                           # (TN, 1) int32 class ids
    a = a_ref[...].astype(jnp.float32)       # (1, C)  per-class alpha

    # Zero padded tail rows of the last tile BEFORE any reduction so
    # unspecified OOB block contents can never feed the row reductions.
    row = jax.lax.broadcasted_iota(jnp.int32, (x.shape[0], 1), 0)       # (TN,1)
    valid = (i * tile_rows + row) < n_rows                              # (TN,1)
    x = jnp.where(valid, x, 0.0)

    # --- log-softmax gather (no full-width normalize, no log underflow) ---
    m = jnp.max(x, axis=1, keepdims=True)                               # (TN,1)
    s = jnp.log(jnp.sum(jnp.exp(x - m), axis=1, keepdims=True))         # (TN,1)

    col = jax.lax.broadcasted_iota(jnp.int32, x.shape, 1)               # (TN,C)
    cmask = (col == t).astype(jnp.float32)                              # one-hot
    x_sel = jnp.sum(x * cmask, axis=1, keepdims=True)                   # (TN,1)
    alpha_sel = jnp.sum(a * cmask, axis=1, keepdims=True)               # (TN,1)
    # NOTE: out-of-range target ids yield a zero one-hot -> zero-loss row
    # (silent), unlike PyTorch which would raise on the gather.

    log_p = x_sel - m - s                                               # (TN,1)
    probs = jnp.exp(log_p)
    per_row = -alpha_sel * _pow_static(1.0 - probs, gamma) * log_p      # (TN,1)

    partial = jnp.sum(jnp.where(valid, per_row, 0.0))                   # scalar

    # --- write partial sum at [0,0] of this tile's (8,128) output block ---
    r8 = jax.lax.broadcasted_iota(jnp.int32, (8, _LANE), 0)
    c8 = jax.lax.broadcasted_iota(jnp.int32, (8, _LANE), 1)
    out_ref[...] = jnp.where((r8 == 0) & (c8 == 0), partial, 0.0)


def focal_loss(inputs, targets, alpha, gamma=2, size_average=True, tile_rows=None):
    """inputs: (N, C) float logits; targets: (N,) int; alpha: (C,) or (C,1)."""
    N, C = inputs.shape

    # Accept bf16 end-to-end (halves HBM read on a BW-bound kernel); anything
    # else computes via f32.
    if inputs.dtype != jnp.bfloat16:
        inputs = inputs.astype(jnp.float32)
    sub = 16 if inputs.dtype == jnp.bfloat16 else 8   # sublane packing multiple

    # ---- per-row VMEM cost with PADDED layouts ----------------------------
    c_pad = _round_up(C, _LANE)
    in_itemsize = 2 if inputs.dtype == jnp.bfloat16 else 4
    logits_row_bytes = c_pad * in_itemsize        # per buffer
    targets_row_bytes = _LANE * 4                 # (TN,1) int32 pads lanes to 128
    temps_row_bytes = 4 * c_pad * 4               # ~4 live f32 (TN,C) temporaries
    row_bytes = 2 * logits_row_bytes + 2 * targets_row_bytes + temps_row_bytes

    vmem_cap = _vmem_capacity_bytes()
    if tile_rows is None:
        # Working-set budget: ~24 MiB on 128 MiB-VMEM parts (v5e/v6e),
        # ~16 MiB on v7x (64 MiB VMEM).
        work_budget = min(vmem_cap // 4, 24 << 20)
        tile_rows = max(sub, (work_budget // row_bytes) // sub * sub)
        tile_rows = min(tile_rows, _round_up(N, sub))
    assert tile_rows % sub == 0, f"tile_rows must be a multiple of {sub}"

    grid = (N + tile_rows - 1) // tile_rows

    t2d = targets.reshape(N, 1).astype(jnp.int32)
    a2d = jnp.asarray(alpha).reshape(1, C).astype(jnp.float32)

    kernel = functools.partial(
        _focal_loss_kernel, gamma=gamma, n_rows=N, tile_rows=tile_rows)

    # Padded-size VMEM need (I/O double buffers + temps + output + alpha),
    # clamped to a generation-safe fraction of physical VMEM (~28 MiB on v7x).
    vmem_need = tile_rows * row_bytes + 2 * (8 * _LANE * 4) + 8 * c_pad * 4
    vmem_limit = int(min(vmem_cap * 7 // 16, max(16 << 20, 2 * vmem_need)))

    partials = pl.pallas_call(
        kernel,
        out_shape=jax.ShapeDtypeStruct((8 * grid, _LANE), jnp.float32),
        grid=(grid,),
        in_specs=[
            pl.BlockSpec((tile_rows, C), lambda i: (i, 0)),   # logits tile
            pl.BlockSpec((tile_rows, 1), lambda i: (i, 0)),   # target ids tile
            pl.BlockSpec((1, C), lambda i: (0, 0)),           # alpha (replicated)
        ],
        out_specs=pl.BlockSpec((8, _LANE), lambda i: (i, 0)),
        compiler_params=pltpu.CompilerParams(
            dimension_semantics=("parallel",),
            vmem_limit_bytes=vmem_limit,
        ),
    )(inputs, t2d, a2d)

    total = jnp.sum(partials)
    if size_average:
        return total / N
    return total


if __name__ == "__main__":
    key = jax.random.PRNGKey(0)
    N, C = 20, 16                      # batch not a tile multiple -> exercises masking

    k1, k2, k3 = jax.random.split(key, 3)
    logits = jax.random.normal(k1, (N, C), dtype=jnp.float32)
    targets = jax.random.randint(k2, (N,), 0, C, dtype=jnp.int32)
    alpha = jax.random.uniform(k3, (C,), dtype=jnp.float32, minval=0.25, maxval=1.0)

    def ref_loss(x, t, a, gamma, size_average):
        logp = jax.nn.log_softmax(x.astype(jnp.float32), axis=1)
        lp = logp[jnp.arange(x.shape[0]), t]
        p = jnp.exp(lp)
        per_row = -a[t] * (1.0 - p) ** gamma * lp
        return jnp.mean(per_row) if size_average else jnp.sum(per_row)

    # forced small tile -> multi-tile grid (3 steps) + tail-row masking
    loss_mean = focal_loss(logits, targets, alpha, gamma=2, size_average=True,
                           tile_rows=8)
    loss_sum = focal_loss(logits, targets, alpha, gamma=2, size_average=False,
                          tile_rows=8)
    # default (budget-based) tile sizing: f32 and bf16 paths
    loss_auto = focal_loss(logits, targets, alpha, gamma=2, size_average=True)
    loss_bf16 = focal_loss(logits.astype(jnp.bfloat16), targets, alpha,
                           gamma=2, size_average=True)
    jax.block_until_ready((loss_mean, loss_sum, loss_auto, loss_bf16))

    assert jnp.allclose(loss_mean, ref_loss(logits, targets, alpha, 2, True),
                        rtol=1e-5, atol=1e-6), loss_mean
    assert jnp.allclose(loss_sum, ref_loss(logits, targets, alpha, 2, False),
                        rtol=1e-5, atol=1e-6), loss_sum
    assert jnp.allclose(loss_auto, ref_loss(logits, targets, alpha, 2, True),
                        rtol=1e-5, atol=1e-6), loss_auto
    assert jnp.allclose(loss_bf16,
                        ref_loss(logits.astype(jnp.bfloat16), targets, alpha, 2, True),
                        rtol=1e-4, atol=1e-5), loss_bf16

    print("KERNEL_OK")
</pallas_src>

<mosaic_0001>
module attributes {stable_mosaic.version = 11 : i64} {
  func.func @_focal_loss_kernel(%arg0: i32, %arg1: memref<8x16xf32, #tpu.memory_space<vmem>>, %arg2: memref<8x1xi32, #tpu.memory_space<vmem>>, %arg3: memref<1x16xf32, #tpu.memory_space<vmem>>, %arg4: memref<8x128xf32, #tpu.memory_space<vmem>>) attributes {dimension_semantics = [#tpu.dimension_semantics<parallel>], iteration_bounds = array<i64: 3>, scalar_prefetch = 0 : i64, scratch_operands = 0 : i64, tpu.core_type = #tpu.core_type<tc>, window_params = [{transform_indices = @transform_0, window_bounds = array<i64: 8, 16>}, {transform_indices = @transform_1, window_bounds = array<i64: 8, 1>}, {pipeline_mode = #tpu.pipeline_mode<synchronous>, transform_indices = @transform_2, window_bounds = array<i64: 1, 16>}, {transform_indices = @transform_3, window_bounds = array<i64: 8, 128>}]} {
    %c0 = arith.constant 0 : index
    %c0_0 = arith.constant 0 : index
    %0 = vector.load %arg1[%c0, %c0_0] : memref<8x16xf32, #tpu.memory_space<vmem>>, vector<8x16xf32>
    %c0_1 = arith.constant 0 : index
    %c0_2 = arith.constant 0 : index
    %1 = vector.load %arg2[%c0_1, %c0_2] : memref<8x1xi32, #tpu.memory_space<vmem>>, vector<8x1xi32>
    %c0_3 = arith.constant 0 : index
    %c0_4 = arith.constant 0 : index
    %2 = vector.load %arg3[%c0_3, %c0_4] : memref<1x16xf32, #tpu.memory_space<vmem>>, vector<1x16xf32>
    %3 = tpu.iota {dimensions = array<i32: 0>} : vector<8x1xi32>
    %c8_i32 = arith.constant 8 : i32
    %4 = arith.muli %arg0, %c8_i32 : i32
    %5 = vector.broadcast %4 : i32 to vector<8x1xi32>
    %6 = arith.addi %5, %3 : vector<8x1xi32>
    %c20_i32 = arith.constant 20 : i32
    %7 = vector.broadcast %c20_i32 : i32 to vector<8x1xi32>
    %8 = arith.cmpi slt, %6, %7 : vector<8x1xi32>
    %cst = arith.constant 0.000000e+00 : f32
    %9 = vector.shape_cast %8 : vector<8x1xi1> to vector<8x1xi1>
    %10 = vector.broadcast %9 : vector<8x1xi1> to vector<8x16xi1>
    %11 = vector.broadcast %cst : f32 to vector<8x16xf32>
    %12 = arith.select %10, %0, %11 : vector<8x16xi1>, vector<8x16xf32>
    %cst_5 = arith.constant dense<0xFF800000> : vector<8xf32>
    %13 = vector.multi_reduction <maximumf>, %12, %cst_5 [1] : vector<8x16xf32> to vector<8xf32>
    %14 = vector.shape_cast %13 : vector<8xf32> to vector<8x1xf32>
    %15 = vector.broadcast %14 : vector<8x1xf32> to vector<8x16xf32>
    %16 = arith.subf %12, %15 : vector<8x16xf32>
    %17 = math.exp %16 : vector<8x16xf32>
    %cst_6 = arith.constant dense<0.000000e+00> : vector<8xf32>
    %18 = vector.multi_reduction <add>, %17, %cst_6 [1] : vector<8x16xf32> to vector<8xf32>
    %19 = vector.shape_cast %18 : vector<8xf32> to vector<8x1xf32>
    %20 = math.log %19 : vector<8x1xf32>
    %21 = tpu.iota {dimensions = array<i32: 1>} : vector<8x16xi32>
    %22 = vector.broadcast %1 : vector<8x1xi32> to vector<8x16xi32>
    %23 = arith.cmpi eq, %21, %22 : vector<8x16xi32>
    %24 = arith.extui %23 : vector<8x16xi1> to vector<8x16xi32>
    %25 = arith.sitofp %24 : vector<8x16xi32> to vector<8x16xf32>
    %26 = arith.mulf %12, %25 : vector<8x16xf32>
    %cst_7 = arith.constant dense<0.000000e+00> : vector<8xf32>
    %27 = vector.multi_reduction <add>, %26, %cst_7 [1] : vector<8x16xf32> to vector<8xf32>
    %28 = vector.shape_cast %27 : vector<8xf32> to vector<8x1xf32>
    %29 = vector.broadcast %2 : vector<1x16xf32> to vector<8x16xf32>
    %30 = arith.mulf %29, %25 : vector<8x16xf32>
    %cst_8 = arith.constant dense<0.000000e+00> : vector<8xf32>
    %31 = vector.multi_reduction <add>, %30, %cst_8 [1] : vector<8x16xf32> to vector<8xf32>
    %32 = vector.shape_cast %31 : vector<8xf32> to vector<8x1xf32>
    %33 = arith.subf %28, %14 : vector<8x1xf32>
    %34 = arith.subf %33, %20 : vector<8x1xf32>
    %35 = math.exp %34 : vector<8x1xf32>
    %cst_9 = arith.constant 0.000000e+00 : f32
    %36 = vector.broadcast %cst_9 : f32 to vector<8x1xf32>
    %37 = arith.subf %36, %32 : vector<8x1xf32>
    %cst_10 = arith.constant 1.000000e+00 : f32
    %38 = vector.broadcast %cst_10 : f32 to vector<8x1xf32>
    %39 = arith.subf %38, %35 : vector<8x1xf32>
    %40 = arith.mulf %39, %39 : vector<8x1xf32>
    %41 = arith.mulf %37, %40 : vector<8x1xf32>
    %42 = arith.mulf %41, %34 : vector<8x1xf32>
    %cst_11 = arith.constant 0.000000e+00 : f32
    %43 = vector.broadcast %cst_11 : f32 to vector<8x1xf32>
    %44 = arith.select %8, %42, %43 : vector<8x1xi1>, vector<8x1xf32>
    %45 = vector.shape_cast %44 : vector<8x1xf32> to vector<1x8x1xf32>
    %cst_12 = arith.constant dense<0.000000e+00> : vector<1xf32>
    %46 = vector.multi_reduction <add>, %45, %cst_12 [1, 2] : vector<1x8x1xf32> to vector<1xf32>
    %47 = vector.shape_cast %46 : vector<1xf32> to vector<1x1x1xf32>
    %48 = vector.extract %47[0, 0, 0] : f32 from vector<1x1x1xf32>
    %49 = tpu.iota {dimensions = array<i32: 0>} : vector<8x128xi32>
    %50 = tpu.iota {dimensions = array<i32: 1>} : vector<8x128xi32>
    %c0_i32 = arith.constant 0 : i32
    %51 = vector.broadcast %c0_i32 : i32 to vector<8x128xi32>
    %52 = arith.cmpi eq, %49, %51 : vector<8x128xi32>
    %c0_i32_13 = arith.constant 0 : i32
    %53 = vector.broadcast %c0_i32_13 : i32 to vector<8x128xi32>
    %54 = arith.cmpi eq, %50, %53 : vector<8x128xi32>
    %55 = arith.andi %52, %54 : vector<8x128xi1>
    %cst_14 = arith.constant 0.000000e+00 : f32
    %56 = vector.broadcast %48 : f32 to vector<8x128xf32>
    %57 = vector.broadcast %cst_14 : f32 to vector<8x128xf32>
    %58 = arith.select %55, %56, %57 : vector<8x128xi1>, vector<8x128xf32>
    %c0_15 = arith.constant 0 : index
    %c0_16 = arith.constant 0 : index
    %59 = vector.load %arg4[%c0_15, %c0_16] : memref<8x128xf32, #tpu.memory_space<vmem>>, vector<8x128xf32>
    tpu.vector_store %arg4[%c0_15, %c0_16], %58 {strides = array<i32>} : memref<8x128xf32, #tpu.memory_space<vmem>>, vector<8x128xf32>,
    return
  }
  func.func @transform_0(%arg0: i32) -> (i32, i32) {
    %c0_i32 = arith.constant 0 : i32
    %c0_i32_0 = arith.constant 0 : i32
    return %arg0, %c0_i32 : i32, i32
  }
  func.func @transform_1(%arg0: i32) -> (i32, i32) {
    %c0_i32 = arith.constant 0 : i32
    %c0_i32_0 = arith.constant 0 : i32
    return %arg0, %c0_i32 : i32, i32
  }
  func.func @transform_2(%arg0: i32) -> (i32, i32) {
    %c0_i32 = arith.constant 0 : i32
    %c0_i32_0 = arith.constant 0 : i32
    %c0_i32_1 = arith.constant 0 : i32
    return %c0_i32, %c0_i32_0 : i32, i32
  }
  func.func @transform_3(%arg0: i32) -> (i32, i32) {
    %c0_i32 = arith.constant 0 : i32
    %c0_i32_0 = arith.constant 0 : i32
    return %arg0, %c0_i32 : i32, i32
  }
}

</mosaic_0001>

<bundles_post_ra>
// kernel: tpu_custom_call.1
= control target key start
LH: loop header
LB: loop body
LE: loop exit
PB: predicated region body
PF: predicated region fallthrough
CT: control target
= control target key end

     0   :  { %8 = vsyncpa [#allocation3], 0  ;;  %s595_s0 = inlined_call_operand.vmem [shape: f32[20,16], index: 0, kind: input, shape index: {}]   ;;  %s596_s1 = inlined_call_operand.vmem [shape: s32[20,1], index: 1, kind: input, shape index: {}]   ;;  %s597_s2 = inlined_call_operand.vmem [shape: f32[1,16], index: 2, kind: input, shape index: {}]   ;;  %s598_s3 = inlined_call_operand.hbm [shape: f32[24,128], index: 3, kind: output, shape index: {}]  }
   0x1   :  { %10 = vsyncpa [#allocation3 + $0x1], 0  ;;  %s490_s12 = smov 0   ;;  %s492_s13 = smov 0  }
   0x2   :  { %s494_s14 = smov 0   ;;  %s496_s15 = smov 0  }
   0x3 LB: > { %s511_s16 = sadd.s32 4294967295, %s466_s15   ;;  %s340_s17 = sadd.s32 4294967294, %s466_s15   ;;  %s466_s15 = sphi %s496_s15, %s604_s15   ;;  %s462_s14 = sphi %s494_s14, %s603_s14   ;;  %s458_s13 = sphi %s492_s13, %s602_s13   ;;  %s454_s12 = sphi %s490_s12, %s601_s12  }
   0x4   : > { %s515_s18 = sadd.s32 1, %s466_s15   ;;  %s96_s19 = sadd.s32 1, %s462_s14 }
   0x5   : > { %s93_s20 = ssub.s32 %s466_s15, %s515_s18  ;;  %p106_p0 = scmp.ne.s32.totalorder %s462_s14, %s458_s13 }
   0x6   : > { %p94_p1 = scmp.eq.s32.totalorder %s93_s20, 0  ;;  %p107_p2 = scmp.eq.s32.totalorder %s511_s16, 2 }
   0x7   : > { %p112_p3 = scmp.ne.s32.totalorder %s458_s13, %s454_s12  ;;  %p113_p4 = scmp.eq.s32.totalorder %s340_s17, 2 }
   0x8   : > { %s526_s21 = scalar_select %p94_p1, %s462_s14, %s96_s19  }
   0x9   : > { %p528_p5 = por %p107_p2, %p106_p0  ;;  %p532_p6 = por %p113_p4, %p112_p3 }
   0xa   : > { %p343_p7 = scmp.ge.s32.totalorder %s466_s15, 1  ;;  %p148_p8 = scmp.lt.s32.totalorder %s466_s15, 4 }
   0xc   : > { %p149_p9 = pnand %p343_p7, %p148_p8 }
   0xd   : > { %p175_p10 = scmp.lt.s32.totalorder (!%p149_p9), %s511_s16, 2  ;;  %s347_s24 = sshll.u32 (!%p149_p9), %s511_s16, 3 }
   0xe   : > { %152 = sbr.rel (%p149_p9) target bundleno = 490 (0x1ea), region = 32  ;;  %s172_s8 = sand.u32 (!%p149_p9), 1, %s458_s13  }
   0xf   : > { %s344_s9 = sshll.u32 (!%p149_p9), %s172_s8, 3  ;;  %s264_s17 = scalar_lea.hbm (!%p149_p9), %s598_s3, %s347_s24 }
  0x10   : > { %s174_s19 = scalar_lea.vmem (!%p149_p9), [#allocation2], %s344_s9  ;;  %s254_s27 = scalar_lea.sflag (!%p149_p9), [#allocation3], %s172_s8 }
  0x11   : > { %s266_s20 = sshll.u32 (!%p149_p9), %s174_s19, 4  ;;  %s424_s30 = scalar_lea.hbm (!%p149_p9), %s598_s3, 24  ;;  %s267_s20 = int_to_ptr.vmem [resolvable:$true] %s266_s20 }
  0x13   : > { %v186_v0 = vlaneseq  ;;  %v189_v1 = vstv %s347_s24  ;;  %v468_v2 = vmov 0   ;;  %s176_s25 = scalar_select %p175_p10, %s511_s16, 2  ;;  %vm195_vm0 = vcmask 130048   ;;  %v397_v15 = vld [vmem:[%s597_s2] ss:$0 sm:$0xff] }
  0x14   : > { %396 = vset.pattern.permute.xlu0 %v468_v2  ;;  %v469_v17 = vmov 0.0   ;;  %vm236_vm3 = vcmask 7168  }
  0x15   : > { %v543_v3 = vshrl.u32 %v186_v0, 7  ;;  %s345_s26 = sshll.u32 %s176_s25, 3  ;;  %v208_v14 = vand.u32 127, %v186_v0  ;;  %s268_s25 = sshll.u32 %s264_s17, 4  ;;  %s269_s25 = int_to_ptr.hbm [resolvable:$true] %s268_s25 }
  0x16   : > { %s178_s29 = scalar_lea.vmem %s595_s0, %s345_s26  ;;  %s182_s5 = scalar_lea.vmem %s596_s1, %s345_s26 }
  0x17   : > { %v190_v4 = vadd.s32 %v189_v1, %v543_v3  ;;  %v183_v5 = vld [vmem:[%s178_s29] sm:$0xff]  ;;  %vm247_vm4 = vcmp.eq.s32.totalorder %v543_v3, 0  ;;  %vm248_vm5 = vcmp.eq.s32.totalorder %v208_v14, 0  ;;  %s418_s16 = sshra.s32 %s269_s25, 4  ;;  %s419_s16 = int_to_ptr.hbm [resolvable:$true] %s418_s16 }
  0x18   : > { %v184_v8 = vld [vmem:[%s182_s5] sm:$0xff]  ;;  %vm249_vm6 = vmand %vm247_vm4, %vm248_vm5  ;;  %s420_s28 = scalar_lea.hbm %s419_s16, 8  ;;  %p425_p0 = scmp.lt.s32.totalorder %s419_s16, %s598_s3 }
  0x19   : > { %vm191_vm1 = vcmp.lt.s32.totalorder %v190_v4, 20  ;;  %p421_p11 = scmp.ne.s32.totalorder %s419_s16, %s420_s28  ;;  %p426_p1 = scmp.lt.s32.totalorder %s424_s30, %s420_s28 }
  0x1a   : > { %v194_v6 = vsel %vm191_vm1, %v183_v5, 0.0 }
  0x1b   : > { %v196_v7 = vsel %vm195_vm0, %v194_v6, -inf  ;;  %p422_p12 = pnand %p421_p11, %p528_p5  ;;  %p427_p2 = por %p426_p1, %p425_p0 }
  0x1c   : > { %197 = vmax.xlane.f32.xlu0 %v196_v7 }
  0x1d   : > { %p423_p13 = pneg %p422_p12 }
  0x1f   : > { %p428_p3 = pnand %p427_p2, %p423_p13 }
  0x30   : > { %210 = vperm.xlu0 %396, %v184_v8  }
  0x8f   : > { %v198_v9 = vpop.xlane.xlu0 %197 }
  0x90   : > { %v199_v10 = vsub.f32 %v194_v6, %v198_v9 }
  0x92   : > { %v200_v11 = vmul.f32 1.442695, %v199_v10 }
  0x94   : > { %398 = vpow2.f32 %v200_v11 }
  0x9a   : > { %v399_v12 = vpop.eup %398 }
  0x9b   : > { %v202_v13 = vsel %vm195_vm0, %v399_v12, 0.0 }
  0x9c   : > { %203 = vadd.xlane.f32.xlu1 %v202_v13 }
  0xa2   : > { %v211_v16 = vpop.permute.xlu0 %210 }
  0xa3   : > { %vm212_vm2 = vcmp.eq.s32.totalorder %v208_v14, %v211_v16 }
  0xa4   : > { %v348_v18 = vsel %vm212_vm2, 1.0, %v469_v17 }
  0xa5   : > { %v222_v19 = vmul.f32 %v397_v15, %v348_v18  ;;  %v215_v20 = vmul.f32 %v348_v18, %v194_v6 }
  0xa7   : > { %v223_v21 = vsel %vm195_vm0, %v222_v19, 0.0  ;;  %v216_v22 = vsel %vm195_vm0, %v215_v20, 0.0 }
  0xa8   : > { %224 = vadd.xlane.f32.xlu2 %v223_v21  ;;  %217 = vadd.xlane.f32.xlu1 %v216_v22 }
 0x10f   : > { %v204_v23 = vpop.xlane.xlu1 %203 }
 0x110   : > { %400 = vlog2.f32 %v204_v23 }
 0x116   : > { %v401_v24 = vpop.eup %400 }
 0x117   : > { %v206_v26 = vmul.f32 0.6931472, %v401_v24 }
 0x11b   : > { %v218_v25 = vpop.xlane.xlu1 %217  ;;  %v225_v31 = vpop.xlane.xlu2 %224 }
 0x11c   : > { %v226_v27 = vsub.f32 %v218_v25, %v198_v9  ;;  %v230_v33 = vsub.f32 0.0, %v225_v31 }
 0x11e   : > { %v227_v28 = vsub.f32 %v226_v27, %v206_v26 }
 0x120   : > { %v228_v29 = vmul.f32 1.442695, %v227_v28 }
 0x122   : > { %402 = vpow2.f32 %v228_v29 }
 0x128   : > { %v403_v30 = vpop.eup %402 }
 0x129   : > { %v231_v32 = vsub.f32 1.0, %v403_v30 }
 0x12b   : > { %v232_v34 = vmul.f32 %v231_v32, %v231_v32 }
 0x12d   : > { %v233_v35 = vmul.f32 %v232_v34, %v230_v33 }
 0x12f   : > { %v234_v36 = vmul.f32 %v233_v35, %v227_v28 }
 0x131   : > { %v235_v37 = vsel %vm191_vm1, %v234_v36, 0.0 }
 0x132   : > { %v237_v38 = vsel %vm236_vm3, %v235_v37, 0.0 }
 0x133   : > { %238 = vadd.xlane.f32.xlu2 %v237_v38 }
 0x1a6   : > { %v239_v39 = vpop.xlane.xlu2 %238 }
 0x1a7   : > { %v240_v40 = vrot.slane %v239_v39, 4 }
 0x1a9   : > { %v241_v41 = vadd.f32 %v240_v40, %v239_v39 }
 0x1ab   : > { %v242_v42 = vrot.slane %v241_v41, 2 }
 0x1ad   : > { %v243_v43 = vadd.f32 %v242_v42, %v241_v41 }
 0x1af   : > { %v244_v44 = vrot.slane %v243_v43, 1 }
 0x1b1   : > { %v245_v45 = vadd.f32 %v244_v44, %v243_v43 }
 0x1b3   : > { %353 = vpush %v245_v45 }
 0x1e4   : > { %s354_s26 = spop %353 }
 0x1e5   : > { %v250_v46 = vstv %s354_s26 }
 0x1e6   : > { %v251_v47 = vsel %vm249_vm6, %v250_v46, 0.0 }
 0x1e7   : > { %252 = vst [vmem:[%s174_s19] sm:$0xff] %v251_v47 }
 0x1e8   : > { %431 = shalt.err (!%p428_p3)
}
 0x1e9   : > { %355 = dma.vmem_to_hbm [thread:$0]  (%p528_p5), %s267_s20, 128, %s269_s25, %s254_s27  }
 0x1ea PF: > { %p361_p4 = scmp.ge.s32.totalorder %s466_s15, 2  ;;  %s280_s6 = sand.u32 1, %s454_s12  }
 0x1eb   : > { %s281_s7 = scalar_lea.sflag [#allocation3], %s280_s6 }
 0x1ec   : > { %p358_p7 = pnand %p361_p4, %p532_p6 }
 0x1ee   : > { %p359_p8 = pneg %p358_p7 }
 0x1f0   : > { %449 = dma.done.wait (%p359_p8), %s281_s7, 128  }
 0x1f1   : > { %451 = vsyncadd (%p359_p8), %s281_s7, 4294967168  ;;  %p13_p9 = scmp.ge.s32.totalorder %s515_s18, 5   ;;  %s601_s12 = smov %s458_s13 }
 0x1f2   : > { %s602_s13 = smov %s462_s14  ;;  %s603_s14 = smov %s526_s21 }
 0x1f3   : > { %s604_s15 = smov %s515_s18  ;;  %15 = sbr.rel (!%p13_p9) target bundleno = 3 (0x3), region = 70 }
 0x1f8   :  { %287 = vsyncpa [#allocation3], 1 }
 0x1f9   :  { %289 = vsyncpa [#allocation3 + $0x1], 1 }

</bundles_post_ra>
